<compile_context>
chip_gen: v7x
topology: tpu7x:2x2x1
jax: 0.10.0
libtpu: 0.0.40
codegen_flags: <defaults>
</compile_context>

<pallas_src>
import jax
import jax.numpy as jnp
from jax.experimental import pallas as pl
from jax.experimental.pallas import tpu as pltpu

_LANE = 128


def _round_up(x, m):
    return ((x + m - 1) // m) * m


# ----------------------------------------------------------------------------- kernel
def dqn_kernel(x_ref, w1_ref, b1_ref, w2_ref, b2_ref, w3_ref, b3_ref, o_ref):
    # fc1 + ReLU: MXU in weight dtype (bf16), f32 accumulate; elementwise in f32.
    x = x_ref[...].astype(w1_ref.dtype)
    h1 = jnp.dot(x, w1_ref[...], preferred_element_type=jnp.float32)
    h1 = jnp.maximum(h1 + b1_ref[...], 0.0)
    # fc2 + ReLU
    h2 = jnp.dot(h1.astype(w2_ref.dtype), w2_ref[...],
                 preferred_element_type=jnp.float32)
    h2 = jnp.maximum(h2 + b2_ref[...], 0.0)
    # fc3 (no activation) -> lane-dense (TM, 128) slab, stored bf16 to halve the
    # dominant HBM writeback stream; wrapper slices/casts back to f32.
    out = jnp.dot(h2.astype(w3_ref.dtype), w3_ref[...],
                  preferred_element_type=jnp.float32)
    o_ref[...] = (out + b3_ref[...]).astype(o_ref.dtype)


# ------------------------------------------------------------------------ param prep
def prepare_dqn_params(params, weight_dtype=jnp.bfloat16):
    """Zero-pad hidden/output feature dims to 128 lanes and cast weights to bf16.

    Zero padding preserves forward semantics exactly: padded hidden units see zero
    weights and zero bias (ReLU(0)=0) and contribute nothing downstream; padded
    output columns are sliced off in dqn_forward. Do this ONCE, not per call.
    """
    w1, b1, w2, b2, w3, b3 = (params["w1"], params["b1"], params["w2"],
                              params["b2"], params["w3"], params["b3"])
    S, H = w1.shape
    A = w3.shape[1]
    Hp = _round_up(H, _LANE)
    Ap = _round_up(A, _LANE)

    def pad_to(a, shape, dtype):
        out = jnp.zeros(shape, dtype)
        return out.at[tuple(slice(0, s) for s in a.shape)].set(a.astype(dtype))

    return {
        "w1": pad_to(w1, (S, Hp), weight_dtype),
        "b1": pad_to(b1, (1, Hp), jnp.float32),
        "w2": pad_to(w2, (Hp, Hp), weight_dtype),
        "b2": pad_to(b2, (1, Hp), jnp.float32),
        "w3": pad_to(w3, (Hp, Ap), weight_dtype),
        "b3": pad_to(b3, (1, Ap), jnp.float32),
    }


# ----------------------------------------------------------------------- tiling policy
def _pick_tiling(B, block_m):
    """Bucketed, megacore-balanced batch tiling. Returns (padded_B, tile_rows).

    - B <= block_m: pad to the next power of two (min 8) so the act/train loop only
      ever compiles a handful of kernel shapes; batches >= 512 split into two equal
      tiles so v7x's two TensorCores get balanced work.
    - B  > block_m: equal block_m tiles, grid forced to an even length for megacore
      balance (the <=1-tile overpad only matters for B > 2*block_m, which a DQN
      replay loop never reaches in practice).
    """
    if B <= block_m:
        bp = max(8, pl.next_power_of_2(B))
        tm = bp if bp < 512 else bp // 2
        return bp, tm
    n = pl.cdiv(B, block_m)
    n += n % 2
    return n * block_m, block_m


def _dqn_small_xla(x, p, action_size):
    """Escape hatch for tiny (acting) batches: plain XLA, no Pallas launch cost."""
    h = jnp.maximum(jnp.dot(x, p["w1"].astype(jnp.float32)) + p["b1"], 0.0)
    h = jnp.maximum(jnp.dot(h, p["w2"].astype(jnp.float32)) + p["b2"], 0.0)
    out = jnp.dot(h, p["w3"].astype(jnp.float32)) + p["b3"]
    return out[:, :action_size]


# --------------------------------------------------------------------------- forward
def dqn_forward(x, prepared, action_size, *, block_m=2048, small_batch=64,
                force_pallas=False):
    """x: (B, state_size) f32. prepared: output of prepare_dqn_params."""
    B, S = x.shape

    # Small-batch escape hatch (greedy acting, B=1..64): fused Pallas call is pure
    # fixed overhead for <1 KFLOP of work; XLA is at least as fast here.
    if B <= small_batch and not force_pallas:
        return _dqn_small_xla(x, prepared, action_size)

    w1, b1, w2, b2, w3, b3 = (prepared["w1"], prepared["b1"], prepared["w2"],
                              prepared["b2"], prepared["w3"], prepared["b3"])
    Hp = w1.shape[1]
    Ap = w3.shape[1]

    Bp, tm = _pick_tiling(B, block_m)
    if Bp != B:
        # Zero-pad rows; all ops are row-wise, padded rows never touch valid output.
        x = jnp.zeros((Bp, S), x.dtype).at[:B].set(x)
    grid = (Bp // tm,)

    const2d = lambda shape: pl.BlockSpec(shape, lambda i: (0, 0))  # VMEM-resident

    itemsize = lambda a: a.size * a.dtype.itemsize
    cost = pl.CostEstimate(
        flops=2 * Bp * (S * Hp + Hp * Hp + Hp * Ap),
        transcendentals=0,
        bytes_accessed=(Bp * S * 4 + itemsize(w1) + itemsize(b1) + itemsize(w2)
                        + itemsize(b2) + itemsize(w3) + itemsize(b3)
                        + Bp * Ap * 2),  # bf16 output slab
    )

    out_padded = pl.pallas_call(
        dqn_kernel,
        out_shape=jax.ShapeDtypeStruct((Bp, Ap), jnp.bfloat16),
        grid=grid,
        in_specs=[
            pl.BlockSpec((tm, S), lambda i: (i, 0)),   # x marches over batch
            const2d(w1.shape), const2d(b1.shape),
            const2d(w2.shape), const2d(b2.shape),
            const2d(w3.shape), const2d(b3.shape),
        ],
        out_specs=pl.BlockSpec((tm, Ap), lambda i: (i, 0)),
        compiler_params=pltpu.CompilerParams(
            dimension_semantics=("parallel",),   # megacore split on v7x
        ),
        cost_estimate=cost,
    )(x, w1, b1, w2, b2, w3, b3)

    return out_padded[:B, :action_size].astype(jnp.float32)


# ------------------------------------------------------------------- init & reference
def init_dqn_params(key, state_size, action_size, hidden=64):
    """Deterministic init mimicking PyTorch Linear's U(-1/sqrt(fan_in), 1/sqrt(fan_in))."""
    ks = jax.random.split(key, 6)

    def linear(kw, kb, fan_in, fan_out):
        bound = 1.0 / jnp.sqrt(jnp.float32(fan_in))
        w = jax.random.uniform(kw, (fan_in, fan_out), jnp.float32, -bound, bound)
        b = jax.random.uniform(kb, (1, fan_out), jnp.float32, -bound, bound)
        return w, b

    w1, b1 = linear(ks[0], ks[1], state_size, hidden)
    w2, b2 = linear(ks[2], ks[3], hidden, hidden)
    w3, b3 = linear(ks[4], ks[5], hidden, action_size)
    return {"w1": w1, "b1": b1, "w2": w2, "b2": b2, "w3": w3, "b3": b3}


def dqn_reference(x, p):
    h1 = jnp.maximum(x @ p["w1"] + p["b1"], 0.0)
    h2 = jnp.maximum(h1 @ p["w2"] + p["b2"], 0.0)
    return h2 @ p["w3"] + p["b3"]


if __name__ == "__main__":
    key = jax.random.PRNGKey(0)
    k_x, k_x2, k_p = jax.random.split(key, 3)

    batch = 2
    state_size = 8
    action_size = 4

    params = init_dqn_params(k_p, state_size, action_size)
    prepared = prepare_dqn_params(params)  # pad + bf16 once, reuse every step

    # Tiny acting-style batch: goes through the XLA escape hatch...
    x = jax.random.normal(k_x, (batch, state_size), jnp.float32)
    ref = dqn_reference(x, params)
    out_small = jax.block_until_ready(dqn_forward(x, prepared, action_size))
    assert out_small.shape == (batch, action_size)
    assert jnp.allclose(out_small, ref, atol=2e-2, rtol=2e-2), "mismatch (B=2, XLA path)"

    # ...and also forced through the Pallas path (padded to an 8-row single tile).
    out_small_p = jax.block_until_ready(
        dqn_forward(x, prepared, action_size, force_pallas=True))
    assert out_small_p.shape == (batch, action_size)
    assert jnp.allclose(out_small_p, ref, atol=2e-2, rtol=2e-2), "mismatch (B=2, Pallas)"

    # Replay-buffer-style batch: bucketed to 1024 rows -> two balanced 512-row tiles.
    big_batch = 640
    xb = jax.random.normal(k_x2, (big_batch, state_size), jnp.float32)
    out_b = jax.block_until_ready(dqn_forward(xb, prepared, action_size))
    ref_b = dqn_reference(xb, params)
    assert out_b.shape == (big_batch, action_size)
    # bf16 MXU operands + bf16 output store -> compare with bf16-level tolerance.
    assert jnp.allclose(out_b, ref_b, atol=2e-2, rtol=2e-2), "mismatch (B=640, Pallas)"

    print("KERNEL_OK")
</pallas_src>

<mosaic_0001>
module attributes {stable_mosaic.version = 11 : i64} {
  func.func @dqn_kernel(%arg0: i32, %arg1: memref<8x8xf32, #tpu.memory_space<vmem>>, %arg2: memref<8x128xbf16, #tpu.memory_space<vmem>>, %arg3: memref<1x128xf32, #tpu.memory_space<vmem>>, %arg4: memref<128x128xbf16, #tpu.memory_space<vmem>>, %arg5: memref<1x128xf32, #tpu.memory_space<vmem>>, %arg6: memref<128x128xbf16, #tpu.memory_space<vmem>>, %arg7: memref<1x128xf32, #tpu.memory_space<vmem>>, %arg8: memref<8x128xbf16, #tpu.memory_space<vmem>>) attributes {dimension_semantics = [#tpu.dimension_semantics<parallel>], iteration_bounds = array<i64: 1>, scalar_prefetch = 0 : i64, scratch_operands = 0 : i64, tpu.core_type = #tpu.core_type<tc>, window_params = [{transform_indices = @transform_0, window_bounds = array<i64: 8, 8>}, {pipeline_mode = #tpu.pipeline_mode<synchronous>, transform_indices = @transform_1, window_bounds = array<i64: 8, 128>}, {pipeline_mode = #tpu.pipeline_mode<synchronous>, transform_indices = @transform_2, window_bounds = array<i64: 1, 128>}, {pipeline_mode = #tpu.pipeline_mode<synchronous>, transform_indices = @transform_3, window_bounds = array<i64: 128, 128>}, {pipeline_mode = #tpu.pipeline_mode<synchronous>, transform_indices = @transform_4, window_bounds = array<i64: 1, 128>}, {pipeline_mode = #tpu.pipeline_mode<synchronous>, transform_indices = @transform_5, window_bounds = array<i64: 128, 128>}, {pipeline_mode = #tpu.pipeline_mode<synchronous>, transform_indices = @transform_6, window_bounds = array<i64: 1, 128>}, {transform_indices = @transform_7, window_bounds = array<i64: 8, 128>}]} {
    %c0 = arith.constant 0 : index
    %c0_0 = arith.constant 0 : index
    %0 = vector.load %arg1[%c0, %c0_0] : memref<8x8xf32, #tpu.memory_space<vmem>>, vector<8x8xf32>
    %1 = arith.truncf %0 : vector<8x8xf32> to vector<8x8xbf16>
    %c0_1 = arith.constant 0 : index
    %c0_2 = arith.constant 0 : index
    %2 = vector.load %arg2[%c0_1, %c0_2] : memref<8x128xbf16, #tpu.memory_space<vmem>>, vector<8x128xbf16>
    %cst = arith.constant dense<0.000000e+00> : vector<8x128xf32>
    %3 = tpu.matmul %1, %2, %cst {dimension_numbers = #tpu.dot_dimension_numbers<[1], [0], [0], [1], [0, 0, 1, 1], [], []>} : vector<8x8xbf16>, vector<8x128xbf16>, vector<8x128xf32> -> vector<8x128xf32>
    %c0_3 = arith.constant 0 : index
    %c0_4 = arith.constant 0 : index
    %4 = vector.load %arg3[%c0_3, %c0_4] : memref<1x128xf32, #tpu.memory_space<vmem>>, vector<1x128xf32>
    %5 = vector.broadcast %4 : vector<1x128xf32> to vector<8x128xf32>
    %6 = arith.addf %3, %5 : vector<8x128xf32>
    %cst_5 = arith.constant 0.000000e+00 : f32
    %7 = vector.broadcast %cst_5 : f32 to vector<8x128xf32>
    %8 = arith.maximumf %6, %7 : vector<8x128xf32>
    %9 = arith.truncf %8 : vector<8x128xf32> to vector<8x128xbf16>
    %c0_6 = arith.constant 0 : index
    %c0_7 = arith.constant 0 : index
    %10 = vector.load %arg4[%c0_6, %c0_7] : memref<128x128xbf16, #tpu.memory_space<vmem>>, vector<128x128xbf16>
    %cst_8 = arith.constant dense<0.000000e+00> : vector<8x128xf32>
    %11 = tpu.matmul %9, %10, %cst_8 {dimension_numbers = #tpu.dot_dimension_numbers<[1], [0], [0], [1], [0, 0, 1, 1], [], []>} : vector<8x128xbf16>, vector<128x128xbf16>, vector<8x128xf32> -> vector<8x128xf32>
    %c0_9 = arith.constant 0 : index
    %c0_10 = arith.constant 0 : index
    %12 = vector.load %arg5[%c0_9, %c0_10] : memref<1x128xf32, #tpu.memory_space<vmem>>, vector<1x128xf32>
    %13 = vector.broadcast %12 : vector<1x128xf32> to vector<8x128xf32>
    %14 = arith.addf %11, %13 : vector<8x128xf32>
    %cst_11 = arith.constant 0.000000e+00 : f32
    %15 = vector.broadcast %cst_11 : f32 to vector<8x128xf32>
    %16 = arith.maximumf %14, %15 : vector<8x128xf32>
    %17 = arith.truncf %16 : vector<8x128xf32> to vector<8x128xbf16>
    %c0_12 = arith.constant 0 : index
    %c0_13 = arith.constant 0 : index
    %18 = vector.load %arg6[%c0_12, %c0_13] : memref<128x128xbf16, #tpu.memory_space<vmem>>, vector<128x128xbf16>
    %cst_14 = arith.constant dense<0.000000e+00> : vector<8x128xf32>
    %19 = tpu.matmul %17, %18, %cst_14 {dimension_numbers = #tpu.dot_dimension_numbers<[1], [0], [0], [1], [0, 0, 1, 1], [], []>} : vector<8x128xbf16>, vector<128x128xbf16>, vector<8x128xf32> -> vector<8x128xf32>
    %c0_15 = arith.constant 0 : index
    %c0_16 = arith.constant 0 : index
    %20 = vector.load %arg7[%c0_15, %c0_16] : memref<1x128xf32, #tpu.memory_space<vmem>>, vector<1x128xf32>
    %21 = vector.broadcast %20 : vector<1x128xf32> to vector<8x128xf32>
    %22 = arith.addf %19, %21 : vector<8x128xf32>
    %23 = arith.truncf %22 : vector<8x128xf32> to vector<8x128xbf16>
    %c0_17 = arith.constant 0 : index
    %c0_18 = arith.constant 0 : index
    %24 = vector.load %arg8[%c0_17, %c0_18] : memref<8x128xbf16, #tpu.memory_space<vmem>>, vector<8x128xbf16>
    tpu.vector_store %arg8[%c0_17, %c0_18], %23 {strides = array<i32>} : memref<8x128xbf16, #tpu.memory_space<vmem>>, vector<8x128xbf16>,
    return
  }
  func.func @transform_0(%arg0: i32) -> (i32, i32) {
    %c0_i32 = arith.constant 0 : i32
    %c0_i32_0 = arith.constant 0 : i32
    return %arg0, %c0_i32 : i32, i32
  }
  func.func @transform_1(%arg0: i32) -> (i32, i32) {
    %c0_i32 = arith.constant 0 : i32
    %c0_i32_0 = arith.constant 0 : i32
    %c0_i32_1 = arith.constant 0 : i32
    return %c0_i32, %c0_i32_0 : i32, i32
  }
  func.func @transform_2(%arg0: i32) -> (i32, i32) {
    %c0_i32 = arith.constant 0 : i32
    %c0_i32_0 = arith.constant 0 : i32
    %c0_i32_1 = arith.constant 0 : i32
    return %c0_i32, %c0_i32_0 : i32, i32
  }
  func.func @transform_3(%arg0: i32) -> (i32, i32) {
    %c0_i32 = arith.constant 0 : i32
    %c0_i32_0 = arith.constant 0 : i32
    %c0_i32_1 = arith.constant 0 : i32
    return %c0_i32, %c0_i32_0 : i32, i32
  }
  func.func @transform_4(%arg0: i32) -> (i32, i32) {
    %c0_i32 = arith.constant 0 : i32
    %c0_i32_0 = arith.constant 0 : i32
    %c0_i32_1 = arith.constant 0 : i32
    return %c0_i32, %c0_i32_0 : i32, i32
  }
  func.func @transform_5(%arg0: i32) -> (i32, i32) {
    %c0_i32 = arith.constant 0 : i32
    %c0_i32_0 = arith.constant 0 : i32
    %c0_i32_1 = arith.constant 0 : i32
    return %c0_i32, %c0_i32_0 : i32, i32
  }
  func.func @transform_6(%arg0: i32) -> (i32, i32) {
    %c0_i32 = arith.constant 0 : i32
    %c0_i32_0 = arith.constant 0 : i32
    %c0_i32_1 = arith.constant 0 : i32
    return %c0_i32, %c0_i32_0 : i32, i32
  }
  func.func @transform_7(%arg0: i32) -> (i32, i32) {
    %c0_i32 = arith.constant 0 : i32
    %c0_i32_0 = arith.constant 0 : i32
    return %arg0, %c0_i32 : i32, i32
  }
}

</mosaic_0001>

<bundles_post_ra>
// kernel: tpu_custom_call.1
= control target key start
LH: loop header
LB: loop body
LE: loop exit
PB: predicated region body
PF: predicated region fallthrough
CT: control target
= control target key end

     0   :  { %12 = vsyncpa [#allocation3], 0  ;;  %s752_s0 = inlined_call_operand.hbm [shape: f32[8,8], index: 0, kind: input, shape index: {}]   ;;  %s753_s1 = inlined_call_operand.hbm [shape: bf16[8,128], index: 1, kind: input, shape index: {}]   ;;  %s754_s2 = inlined_call_operand.vmem [shape: f32[1,128], index: 2, kind: input, shape index: {}]   ;;  %s755_s3 = inlined_call_operand.hbm [shape: bf16[128,128], index: 3, kind: input, shape index: {}]   ;;  %s756_s4 = inlined_call_operand.vmem [shape: f32[1,128], index: 4, kind: input, shape index: {}]   ;;  %s757_s5 = inlined_call_operand.hbm [shape: bf16[128,128], index: 5, kind: input, shape index: {}]   ;;  %s758_s6 = inlined_call_operand.vmem [shape: f32[1,128], index: 6, kind: input, shape index: {}]   ;;  %s759_s7 = inlined_call_operand.hbm [shape: bf16[8,128], index: 7, kind: output, shape index: {}]  }
   0x1   :  { %13 = vsyncpa [#allocation6], 0 }
   0x2   :  { %14 = vsyncpa [#allocation9], 0 }
   0x3   :  { %15 = vsyncpa [#allocation4], 0  ;;  %s611_s24 = smov [#allocation5]   ;;  %s612_s26 = smov [#allocation2]  }
   0x4   :  { %s32_s25 = sshll.u32 %s611_s24, 4  ;;  %s22_s27 = sshll.u32 %s612_s26, 4  ;;  %s33_s25 = int_to_ptr.vmem [resolvable:$true] %s32_s25  ;;  %s23_s27 = int_to_ptr.vmem [resolvable:$true] %s22_s27 }
   0x5   :  { %s493_s30 = scalar_lea.hbm %s753_s1, 64 }
   0x6   :  { %p494_p0 = scmp.ne.s32.totalorder %s753_s1, %s493_s30  ;;  %p497_p1 = scmp.lt.u32.totalorder %s493_s30, %s753_s1 }
   0x8   :  { %p499_p2 = pnand %p497_p1, %p494_p0 }
   0xa   :  { %502 = shalt.err (!%p499_p2)
}
   0xb   :  { %s503_s12 = scalar_lea.vmem %s33_s25, 64  ;;  %p508_p4 = scmp.lt.s32.totalorder %s33_s25, %s33_s25 }
   0xc   :  { %p504_p3 = scmp.ne.s32.totalorder %s33_s25, %s503_s12  ;;  %p509_p5 = scmp.lt.s32.totalorder %s503_s12, %s503_s12 }
   0xe   :  { %p510_p6 = por %p509_p5, %p508_p4 }
  0x10   :  { %p511_p7 = pnand %p510_p6, %p504_p3 }
  0x12   :  { %514 = shalt.err (!%p511_p7)
}
  0x13   :  { %35 = dma.hbm_to_vmem [thread:$0]  %s753_s1, 64, %s33_s25, [#allocation6]  }
  0x14   :  { %s515_s17 = scalar_lea.hbm %s752_s0, 128 }
  0x15   :  { %p516_p8 = scmp.ne.s32.totalorder %s752_s0, %s515_s17  ;;  %p519_p9 = scmp.lt.u32.totalorder %s515_s17, %s752_s0 }
  0x17   :  { %p521_p10 = pnand %p519_p9, %p516_p8 }
  0x19   :  { %524 = shalt.err (!%p521_p10)
}
  0x1a   :  { %s525_s22 = scalar_lea.vmem %s23_s27, 128  ;;  %p530_p12 = scmp.lt.s32.totalorder %s23_s27, %s23_s27 }
  0x1b   :  { %p526_p11 = scmp.ne.s32.totalorder %s23_s27, %s525_s22  ;;  %p531_p13 = scmp.lt.s32.totalorder %s525_s22, %s525_s22 }
  0x1d   :  { %p532_p0 = por %p531_p13, %p530_p12 }
  0x1f   :  { %p533_p1 = pnand %p532_p0, %p526_p11 }
  0x21   :  { %536 = shalt.err (!%p533_p1)
}
  0x22   :  { %25 = dma.hbm_to_vmem [thread:$0]  %s752_s0, 128, %s23_s27, [#allocation3]  }
  0x23   :  { %s613_s24 = smov [#allocation7]   ;;  %s537_s29 = scalar_lea.hbm %s755_s3, 1024 }
  0x24   :  { %s43_s25 = sshll.u32 %s613_s24, 4  ;;  %p538_p2 = scmp.ne.s32.totalorder %s755_s3, %s537_s29  ;;  %s44_s25 = int_to_ptr.vmem [resolvable:$true] %s43_s25 }
  0x25   :  { %p541_p3 = scmp.lt.u32.totalorder %s537_s29, %s755_s3 }
  0x27   :  { %p543_p4 = pnand %p541_p3, %p538_p2 }
  0x29   :  { %546 = shalt.err (!%p543_p4)
}
  0x2a   :  { %s547_s11 = scalar_lea.vmem %s44_s25, 1024  ;;  %p552_p6 = scmp.lt.s32.totalorder %s44_s25, %s44_s25 }
  0x2b   :  { %p548_p5 = scmp.ne.s32.totalorder %s44_s25, %s547_s11  ;;  %p553_p7 = scmp.lt.s32.totalorder %s547_s11, %s547_s11 }
  0x2d   :  { %p554_p8 = por %p553_p7, %p552_p6 }
  0x2f   :  { %p555_p9 = pnand %p554_p8, %p548_p5 }
  0x31   :  { %558 = shalt.err (!%p555_p9)
}
  0x32   :  { %s614_s0 = smov 64   ;;  %s615_s27 = smov 4  }
  0x33   :  { %49 = dma.hbm_to_vmem [thread:$0]  %s755_s3, 1024, %s44_s25, [#allocation6], %s614_s0, %s614_s0, %s615_s27  }
  0x34   :  { %s616_s14 = smov [#allocation8]   ;;  %s559_s18 = scalar_lea.hbm %s757_s5, 1024 }
  0x35   :  { %s57_s15 = sshll.u32 %s616_s14, 4  ;;  %p560_p10 = scmp.ne.s32.totalorder %s757_s5, %s559_s18  ;;  %s58_s15 = int_to_ptr.vmem [resolvable:$true] %s57_s15 }
  0x36   :  { %p563_p11 = scmp.lt.u32.totalorder %s559_s18, %s757_s5 }
  0x38   :  { %p565_p12 = pnand %p563_p11, %p560_p10 }
  0x3a   :  { %568 = shalt.err (!%p565_p12)
}
  0x3b   :  { %s569_s1 = scalar_lea.vmem %s58_s15, 1024  ;;  %p574_p0 = scmp.lt.s32.totalorder %s58_s15, %s58_s15 }
  0x3c   :  { %p570_p13 = scmp.ne.s32.totalorder %s58_s15, %s569_s1  ;;  %p575_p1 = scmp.lt.s32.totalorder %s569_s1, %s569_s1 }
  0x3e   :  { %p576_p2 = por %p575_p1, %p574_p0 }
  0x40   :  { %p577_p3 = pnand %p576_p2, %p570_p13 }
  0x42   :  { %580 = shalt.err (!%p577_p3)
}
  0x43   :  { %63 = dma.hbm_to_vmem [thread:$0]  %s757_s5, 1024, %s58_s15, [#allocation9], %s614_s0, %s614_s0, %s615_s27  }
  0x44   :  { %603 = dma.done.wait [#allocation3], 128  }
  0x45   :  { %604 = vsyncadd [#allocation3], 4294967168 }
  0x46   :  { %605 = dma.done.wait [#allocation6], 1088  }
  0x47   :  { %606 = vsyncadd [#allocation6], 4294966208 }
  0x48   :  { %607 = dma.done.wait [#allocation9], 1024  }
  0x49   :  { %608 = vsyncadd [#allocation9], 4294966272  ;;  %v617_v0 = vmov 0.0   ;;  %vm618_vm0 = vmmov 0   ;;  %vm93_vm1 = vcmask 1043456   ;;  %v79_v2 = vld [vmem:[#allocation2] sm:$0xff] }
  0x4a   :  { %422 = vmatprep.subr.bf16.mxu0 %v617_v0  ;;  %424 = vmatprep.mubr.msk.bf16.mxu0 %vm618_vm0, %v617_v0  ;;  %v81_v1 = vld [vmem:[#allocation5] sm:$0xf]  ;;  %v80_v4 = vpack.c.bf16 %v79_v2, %v79_v2  ;;  %v477_v5 = vld [vmem:[#allocation7] sm:$0xff]   ;;  %vm89_vm2 = vcmask 64512   ;;  %v478_v6 = vld [vmem:[#allocation7 + $0x8] sm:$0xff]   ;;  %s619_s29 = smov [#allocation10]  }
  0x4b   :  { %428 = vmatprep.subr.bf16.mxu1 %v617_v0  ;;  %444 = vmatprep.mubr.msk.bf16.mxu1 %vm618_vm0, %v617_v0  ;;  %v95_v3 = vsel %vm93_vm1, %v81_v1, 0  ;;  %v479_v7 = vld [vmem:[#allocation7 + $0x10] sm:$0xff]   ;;  %v480_v8 = vld [vmem:[#allocation7 + $0x18] sm:$0xff]   ;;  %v481_v9 = vld [vmem:[#allocation7 + $0x20] sm:$0xff]   ;;  %s371_s30 = sshll.u32 %s619_s29, 4  ;;  %s372_s30 = int_to_ptr.vmem [resolvable:$true] %s371_s30 }
  0x4c   :  { %423 = vmatpush3.bf16.msra.mxu0 %v95_v3  ;;  %429 = vmatpush3.bf16.msra.mxu1 %v477_v5  ;;  %v482_v10 = vld [vmem:[#allocation7 + $0x28] sm:$0xff]   ;;  %v483_v11 = vld [vmem:[#allocation7 + $0x30] sm:$0xff]   ;;  %v484_v12 = vld [vmem:[#allocation7 + $0x38] sm:$0xff]   ;;  %p586_p5 = scmp.lt.s32.totalorder %s372_s30, %s372_s30 }
  0x4d   :  { %448 = vmatprep.subr.bf16.mxu0 %v617_v0  ;;  %430 = vmatprep.subr.bf16.mxu1 %v617_v0  ;;  %v485_v13 = vld [vmem:[#allocation8] sm:$0xff]   ;;  %v486_v14 = vld [vmem:[#allocation8 + $0x8] sm:$0xff]   ;;  %v487_v15 = vld [vmem:[#allocation8 + $0x10] sm:$0xff]  }
  0x4e   :  { %v488_v16 = vld [vmem:[#allocation8 + $0x18] sm:$0xff]   ;;  %v489_v17 = vld [vmem:[#allocation8 + $0x20] sm:$0xff]   ;;  %v490_v18 = vld [vmem:[#allocation8 + $0x28] sm:$0xff]  }
  0x4f   :  { %425 = vmatmul.mubr.msk.bf16.vlgmr.msra.gmra.mrb[0].mxu0 %vm89_vm2, %v80_v4  ;;  %v382_v19 = vld [vmem:[%s754_s2] ss:$0 sm:$0xff]  ;;  %v492_v28 = vld [vmem:[#allocation8 + $0x38] sm:$0xff]  }
  0x50   :  { %464 = vmatprep.mubr.msk.bf16.mxu0 %vm618_vm0, %v617_v0  ;;  %431 = vmatpush3.bf16.msra.mxu1 %v478_v6  ;;  %v491_v27 = vld [vmem:[#allocation8 + $0x30] sm:$0xff]  }
  0x51   :  { %432 = vmatprep.subr.bf16.mxu1 %v617_v0  ;;  %449 = vmatpush3.bf16.msra.mxu0 %v485_v13  ;;  %v384_v29 = vld [vmem:[%s756_s4] ss:$0 sm:$0xff]  ;;  %s581_s4 = scalar_lea.vmem %s372_s30, 64 }
  0x52   :  { %450 = vmatprep.subr.bf16.mxu0 %v617_v0  ;;  %v393_v37 = vld [vmem:[%s758_s6] ss:$0 sm:$0xff]  ;;  %p582_p4 = scmp.ne.s32.totalorder %s372_s30, %s581_s4  ;;  %p587_p6 = scmp.lt.s32.totalorder %s581_s4, %s581_s4 }
  0x54   :  { %433 = vmatpush3.bf16.msra.mxu1 %v479_v7  ;;  %p588_p7 = por %p587_p6, %p586_p5 }
  0x55   :  { %434 = vmatprep.subr.bf16.mxu1 %v617_v0  ;;  %451 = vmatpush3.bf16.msra.mxu0 %v486_v14 }
  0x56   :  { %452 = vmatprep.subr.bf16.mxu0 %v617_v0  ;;  %p589_p8 = pnand %p588_p7, %p582_p4 }
  0x58   :  { %435 = vmatpush3.bf16.msra.mxu1 %v480_v8 }
  0x59   :  { %436 = vmatprep.subr.bf16.mxu1 %v617_v0  ;;  %453 = vmatpush3.bf16.msra.mxu0 %v487_v15 }
  0x5a   :  { %454 = vmatprep.subr.bf16.mxu0 %v617_v0 }
  0x5c   :  { %437 = vmatpush3.bf16.msra.mxu1 %v481_v9 }
  0x5d   :  { %438 = vmatprep.subr.bf16.mxu1 %v617_v0  ;;  %455 = vmatpush3.bf16.msra.mxu0 %v488_v16 }
  0x5e   :  { %456 = vmatprep.subr.bf16.mxu0 %v617_v0 }
  0x60   :  { %439 = vmatpush3.bf16.msra.mxu1 %v482_v10 }
  0x61   :  { %440 = vmatprep.subr.bf16.mxu1 %v617_v0  ;;  %457 = vmatpush3.bf16.msra.mxu0 %v489_v17 }
  0x62   :  { %458 = vmatprep.subr.bf16.mxu0 %v617_v0 }
  0x64   :  { %441 = vmatpush3.bf16.msra.mxu1 %v483_v11 }
  0x65   :  { %442 = vmatprep.subr.bf16.mxu1 %v617_v0  ;;  %459 = vmatpush3.bf16.msra.mxu0 %v490_v18 }
  0x66   :  { %460 = vmatprep.subr.bf16.mxu0 %v617_v0 }
  0x68   :  { %443 = vmatpush3.bf16.msra.mxu1 %v484_v12 }
  0x69   :  { %461 = vmatpush3.bf16.msra.mxu0 %v491_v27 }
  0x6a   :  { %462 = vmatprep.subr.bf16.mxu0 %v617_v0 }
  0x6d   :  { %463 = vmatpush3.bf16.msra.mxu0 %v492_v28 }
 0x122   :  { %v131_v20 = vpop.f32.mrb[0].mxu0 }
 0x123   :  { %v132_v21 = vadd.f32 %v382_v19, %v131_v20  ;;  %v426_v22 = vpop.f32.mrb[1].mxu0 }
 0x124   :  { %v134_v23 = vpop.f32.mrb[2].mxu0 }
 0x125   :  { %v137_v24 = vmax.f32 %v132_v21, 0.0  ;;  %v427_v25 = vpop.f32.mrb[3].mxu0 }
 0x127   :  { %v138_v26 = vpack.c.bf16 %v137_v24, %v137_v24 }
 0x129   :  { %445 = vmatmul.mubr.bf16.vlgmr.msra.gmra.mrb[0].mxu1 %v138_v26 }
 0x1fc   :  { %v244_v30 = vpop.f32.mrb[0].mxu1 }
 0x1fd   :  { %v245_v31 = vadd.f32 %v384_v29, %v244_v30  ;;  %v446_v32 = vpop.f32.mrb[1].mxu1 }
 0x1fe   :  { %v247_v33 = vpop.f32.mrb[2].mxu1 }
 0x1ff   :  { %v250_v34 = vmax.f32 %v245_v31, 0.0  ;;  %v447_v35 = vpop.f32.mrb[3].mxu1 }
 0x201   :  { %v251_v36 = vpack.c.bf16 %v250_v34, %v250_v34 }
 0x203   :  { %465 = vmatmul.mubr.bf16.vlgmr.msra.gmra.mrb[4].mxu0 %v251_v36 }
 0x2d6   :  { %v357_v38 = vpop.f32.mrb[4].mxu0 }
 0x2d7   :  { %v358_v39 = vadd.f32 %v393_v37, %v357_v38  ;;  %v466_v40 = vpop.f32.mrb[5].mxu0 }
 0x2d8   :  { %v360_v41 = vpop.f32.mrb[6].mxu0 }
 0x2d9   :  { %v363_v42 = vpack.c.bf16 %v358_v39, %v358_v39  ;;  %v467_v43 = vpop.f32.mrb[7].mxu0 }
 0x2db   :  { %364 = vst [vmem:[#allocation10] sm:$0xf] %v363_v42 }
 0x2dc   :  { %592 = shalt.err (!%p589_p8)
}
 0x2dd   :  { %s593_s6 = scalar_lea.hbm %s759_s7, 64 }
 0x2de   :  { %p594_p9 = scmp.ne.s32.totalorder %s759_s7, %s593_s6  ;;  %p597_p10 = scmp.lt.u32.totalorder %s593_s6, %s759_s7 }
 0x2e0   :  { %p599_p11 = pnand %p597_p10, %p594_p9 }
 0x2e2   :  { %602 = shalt.err (!%p599_p11)
}
 0x2e3   :  { %374 = dma.vmem_to_hbm [thread:$0]  %s372_s30, 64, %s759_s7, [#allocation4]  }
 0x2e4   :  { %609 = dma.done.wait [#allocation4], 64  }
 0x2e5   :  { %610 = vsyncadd [#allocation4], 4294967232 }
 0x2e6   :  { %378 = vsyncpa [#allocation3], 1 }
 0x2e7   :  { %379 = vsyncpa [#allocation6], 1 }
 0x2e8   :  { %380 = vsyncpa [#allocation9], 1 }
 0x2e9   :  { %381 = vsyncpa [#allocation4], 1 }

</bundles_post_ra>
